<compile_context>
chip_gen: v7x
topology: tpu7x:2x2x1
jax: 0.10.0
libtpu: 0.0.40
codegen_flags: <defaults>
</compile_context>

<pallas_src>
import jax
import jax.numpy as jnp
from jax.experimental import pallas as pl
from jax.experimental.pallas import tpu as pltpu


def _nconv_kernel(x_ref, a_ref, o_ref):
    # x_ref: (BC, V, L) native NCVL layout; a_ref: (V, W); o_ref: (BC, W, L).
    bc, v, l = x_ref.shape
    w = a_ref.shape[1]
    # (BC, V, L) -> (BC, L, V): minor-dims transpose on the XLU (VMEM-side).
    xt = jnp.swapaxes(x_ref[...], 1, 2)
    # (BC, L, V) -> (BC*L, V): layout-preserving leading-dim merge (L % 8 == 0).
    x2 = xt.reshape(bc * l, v)
    # One big MXU matmul per grid step, f32 accumulate.
    y2 = jnp.dot(x2, a_ref[...], preferred_element_type=jnp.float32)  # (BC*L, W)
    # (BC*L, W) -> (BC, L, W) -> (BC, W, L) and store at real width W.
    y3 = y2.reshape(bc, l, w)
    o_ref[...] = jnp.swapaxes(y3, 1, 2).astype(o_ref.dtype)


def nconv(x, A, *, block_rows=2048, compute_dtype=None):
    """x: (N, C, V, L), A: (V, W) -> (N, C, W, L)  (== einsum('ncvl,vw->ncwl'))."""
    N, C, V, L = x.shape
    V2, W = A.shape
    assert V == V2, "contraction dim mismatch"
    out_dtype = x.dtype
    B = N * C

    cd = jnp.dtype(compute_dtype) if compute_dtype is not None else jnp.dtype(x.dtype)

    # Free reshape: merge leading dims, keep native (V, L) minor layout.
    xb = x.reshape(B, V, L)
    if cd != xb.dtype:
        xb = xb.astype(cd)
    Ab = A.astype(cd)

    # Batch tile: ~block_rows MXU rows per step (BC * L), capped so there are
    # at least 2 grid steps whenever B >= 2 (feeds both v7x TensorCores; the
    # extra step is ~free on v5e/v6e).
    bc = min(max(1, block_rows // max(L, 1)), B)
    if B >= 2:
        bc = min(bc, max(1, B // 2))
    grid = (pl.cdiv(B, bc),)

    in_bytes = (B * V * L + V * W) * jnp.dtype(cd).itemsize
    out_bytes = B * W * L * jnp.dtype(out_dtype).itemsize
    cost = pl.CostEstimate(
        flops=2 * B * L * V * W,
        transcendentals=0,
        bytes_accessed=in_bytes + out_bytes,
    )

    out = pl.pallas_call(
        _nconv_kernel,
        out_shape=jax.ShapeDtypeStruct((B, W, L), out_dtype),
        grid_spec=pltpu.PrefetchScalarGridSpec(
            num_scalar_prefetch=0,
            grid=grid,
            in_specs=[
                # Native-layout x tile; (V, L) are full array dims -> legal block.
                pl.BlockSpec((bc, V, L), lambda i: (i, 0, 0)),
                # A is tiny: one full block, constant index_map -> VMEM-resident.
                pl.BlockSpec((V, W), lambda i: (0, 0)),
            ],
            out_specs=pl.BlockSpec((bc, W, L), lambda i: (i, 0, 0)),
        ),
        compiler_params=pltpu.CompilerParams(
            dimension_semantics=("parallel",),
            vmem_limit_bytes=32 * 1024 * 1024,
        ),
        cost_estimate=cost,
    )(xb, Ab)

    # Free reshape back to the NCWL layout.
    return out.reshape(N, C, W, L)


if __name__ == "__main__":
    # Small shapes consistent with the forward: N=2, C=4, V=16, L=16, W=16.
    key = jax.random.PRNGKey(0)
    kx, ka = jax.random.split(key)
    N, C, V, L, W = 2, 4, 16, 16, 16
    x = jax.random.normal(kx, (N, C, V, L), dtype=jnp.float32)
    A = jax.random.normal(ka, (V, W), dtype=jnp.float32)

    out = nconv(x, A)
    jax.block_until_ready(out)

    # Correctness check against the pure-JAX einsum reference.
    ref = jnp.einsum("ncvl,vw->ncwl", x, A)
    assert out.shape == (N, C, W, L)
    assert jnp.allclose(out, ref, atol=1e-4, rtol=1e-4)

    print("KERNEL_OK")
</pallas_src>

<mosaic_0001>
module attributes {stable_mosaic.version = 11 : i64} {
  func.func @_nconv_kernel(%arg0: i32, %arg1: memref<4x16x16xf32, #tpu.memory_space<vmem>>, %arg2: memref<16x16xf32, #tpu.memory_space<vmem>>, %arg3: memref<4x16x16xf32, #tpu.memory_space<vmem>>) attributes {dimension_semantics = [#tpu.dimension_semantics<parallel>], iteration_bounds = array<i64: 2>, scalar_prefetch = 0 : i64, scratch_operands = 0 : i64, tpu.core_type = #tpu.core_type<tc>, window_params = [{transform_indices = @transform_0, window_bounds = array<i64: 4, 16, 16>}, {pipeline_mode = #tpu.pipeline_mode<synchronous>, transform_indices = @transform_1, window_bounds = array<i64: 16, 16>}, {transform_indices = @transform_2, window_bounds = array<i64: 4, 16, 16>}]} {
    %c0 = arith.constant 0 : index
    %c0_0 = arith.constant 0 : index
    %c0_1 = arith.constant 0 : index
    %0 = vector.load %arg1[%c0, %c0_0, %c0_1] : memref<4x16x16xf32, #tpu.memory_space<vmem>>, vector<4x16x16xf32>
    %1 = tpu.transpose %0, [0, 2, 1] : vector<4x16x16xf32> -> vector<4x16x16xf32>
    %2 = vector.shape_cast %1 : vector<4x16x16xf32> to vector<64x16xf32>
    %c0_2 = arith.constant 0 : index
    %c0_3 = arith.constant 0 : index
    %3 = vector.load %arg2[%c0_2, %c0_3] : memref<16x16xf32, #tpu.memory_space<vmem>>, vector<16x16xf32>
    %cst = arith.constant dense<0.000000e+00> : vector<64x16xf32>
    %4 = tpu.matmul %2, %3, %cst {dimension_numbers = #tpu.dot_dimension_numbers<[1], [0], [0], [1], [0, 0, 1, 1], [], []>} : vector<64x16xf32>, vector<16x16xf32>, vector<64x16xf32> -> vector<64x16xf32>
    %5 = vector.shape_cast %4 : vector<64x16xf32> to vector<4x16x16xf32>
    %6 = tpu.transpose %5, [0, 2, 1] : vector<4x16x16xf32> -> vector<4x16x16xf32>
    %c0_4 = arith.constant 0 : index
    %c0_5 = arith.constant 0 : index
    %c0_6 = arith.constant 0 : index
    %7 = vector.load %arg3[%c0_4, %c0_5, %c0_6] : memref<4x16x16xf32, #tpu.memory_space<vmem>>, vector<4x16x16xf32>
    tpu.vector_store %arg3[%c0_4, %c0_5, %c0_6], %6 {strides = array<i32>} : memref<4x16x16xf32, #tpu.memory_space<vmem>>, vector<4x16x16xf32>,
    return
  }
  func.func @transform_0(%arg0: i32) -> (i32, i32, i32) {
    %c0_i32 = arith.constant 0 : i32
    %c0_i32_0 = arith.constant 0 : i32
    %c0_i32_1 = arith.constant 0 : i32
    return %arg0, %c0_i32, %c0_i32_0 : i32, i32, i32
  }
  func.func @transform_1(%arg0: i32) -> (i32, i32) {
    %c0_i32 = arith.constant 0 : i32
    %c0_i32_0 = arith.constant 0 : i32
    %c0_i32_1 = arith.constant 0 : i32
    return %c0_i32, %c0_i32_0 : i32, i32
  }
  func.func @transform_2(%arg0: i32) -> (i32, i32, i32) {
    %c0_i32 = arith.constant 0 : i32
    %c0_i32_0 = arith.constant 0 : i32
    %c0_i32_1 = arith.constant 0 : i32
    return %arg0, %c0_i32, %c0_i32_0 : i32, i32, i32
  }
}

</mosaic_0001>

<bundles_post_ra>
// kernel: tpu_custom_call.1
= control target key start
LH: loop header
LB: loop body
LE: loop exit
PB: predicated region body
PF: predicated region fallthrough
CT: control target
= control target key end

     0   :  { %7 = vsyncpa [#allocation3], 0  ;;  %s1185_s0 = inlined_call_operand.hbm [shape: f32[8,16,16], index: 0, kind: input, shape index: {}]   ;;  %s1186_s1 = inlined_call_operand.hbm [shape: f32[16,16], index: 1, kind: input, shape index: {}]   ;;  %s1187_s2 = inlined_call_operand.hbm [shape: f32[8,16,16], index: 2, kind: output, shape index: {}]  }
   0x1   :  { %9 = vsyncpa [#allocation3 + $0x1], 0 }
   0x2   :  { %10 = vsyncpa [#allocation6], 0 }
   0x3   :  { %11 = vsyncpa [#allocation4], 0 }
   0x4   :  { %13 = vsyncpa [#allocation4 + $0x1], 0  ;;  %s958_s9 = smov 0   ;;  %s960_s10 = smov 0  }
   0x5   :  { %s962_s11 = smov 0   ;;  %s964_s12 = smov 0  }
   0x6 LB: > { %s979_s13 = sadd.s32 4294967295, %s934_s12   ;;  %s682_s14 = sadd.s32 4294967294, %s934_s12   ;;  %s934_s12 = sphi %s964_s12, %s1207_s12   ;;  %s930_s11 = sphi %s962_s11, %s1206_s11   ;;  %s926_s10 = sphi %s960_s10, %s1205_s10   ;;  %s922_s9 = sphi %s958_s9, %s1204_s9  }
   0x7   : > { %p39_p0 = scmp.ne.s32.totalorder %s926_s10, %s922_s9  ;;  %p1188_p1 = scmp.eq.s32.totalorder %s979_s13, 0 }
   0x8   : > { %p90_p3 = scmp.eq.s32.totalorder %s682_s14, 1  ;;  %p683_p5 = scmp.ge.s32.totalorder %s934_s12, 1 }
   0x9   : > { %p988_p4 = por %p1188_p1, %p39_p0  ;;  %p97_p7 = scmp.lt.s32.totalorder %s934_s12, 3 }
   0xa   : > { %p993_p6 = por %p90_p3, %p39_p0  ;;  %s936_s18 = smov [#allocation5]  }
   0xb   : > { %s1191_s15 = scalar_select %p988_p4, 1, 0 }
   0xc   : > { %s1192_s16 = scalar_select %p993_p6, 1, 0 }
   0xd   : > { %p998_p8 = pnand %p683_p5, %p97_p7  ;;  %s109_s19 = sshll.u32 %s936_s18, 4  ;;  %s1002_s19 = int_to_ptr.vmem [resolvable:$true] %s109_s19 }
   0xe   : > { %s1014_s21 = sadd.s32 1, %s934_s12   ;;  %s26_s22 = sadd.s32 1, %s930_s11 }
   0xf   : > { %s1193_s17 = scalar_select %p998_p8, 1, 0 }
  0x10   : > { %p752_p9 = pneg %p998_p8  ;;  %s23_s23 = ssub.s32 %s934_s12, %s1014_s21 }
  0x11   : > { %s806_s26 = scalar_lea.hbm %s1186_s1, 256 }
  0x12   : > { %p1009_p11 = pnand %p752_p9, %p1188_p1  ;;  %p807_p12 = scmp.ne.s32.totalorder %s1186_s1, %s806_s26 }
  0x13   : > { %p813_p5 = scmp.lt.u32.totalorder %s806_s26, %s1186_s1 }
  0x14   : > { %p808_p13 = pneg %p1009_p11 }
  0x16   : > { %p809_p0 = pnand %p808_p13, %p807_p12 }
  0x18   : > { %p810_p3 = pneg %p809_p0 }
  0x1a   : > { %p815_p7 = pnand %p813_p5, %p810_p3 }
  0x1c   : > { %818 = shalt.err (!%p815_p7)
}
  0x1d   : > { %s819_s3 = scalar_lea.vmem %s1002_s19, 256  ;;  %p827_p2 = scmp.lt.s32.totalorder %s1002_s19, %s1002_s19 }
  0x1e   : > { %p820_p9 = scmp.ne.s32.totalorder %s1002_s19, %s819_s3  ;;  %p828_p6 = scmp.lt.s32.totalorder %s819_s3, %s819_s3 }
  0x20   : > { %p822_p10 = pnand %p820_p9, %p808_p13  ;;  %p829_p4 = por %p828_p6, %p827_p2 }
  0x22   : > { %p823_p1 = pneg %p822_p10 }
  0x24   : > { %p830_p8 = pnand %p829_p4, %p823_p1 }
  0x26   : > { %833 = shalt.err (!%p830_p8)
}
  0x27   : > { %s937_s4 = smov 128   ;;  %s938_s5 = smov 8  }
  0x28   : > { %755 = dma.hbm_to_vmem [thread:$0]  (!%p1009_p11), %s1186_s1, 256, %s1002_s19, [#allocation6], %s937_s4, %s937_s4, %s938_s5  }
  0x29   : > { %p24_p1 = scmp.eq.s32.totalorder %s23_s23, 0  ;;  %p33_p2 = scmp.ne.s32.totalorder %s930_s11, %s926_s10 }
  0x2a   : > { %p34_p4 = scmp.eq.s32.totalorder %s934_s12, 0  ;;  %p765_p6 = scmp.lt.s32.totalorder %s934_s12, 2 }
  0x2b   : > { %s1048_s8 = scalar_select %p24_p1, %s930_s11, %s26_s22  }
  0x2c   : > { %p35_p8 = por %p34_p4, %p33_p2  ;;  %p1195_p10 = scmp.eq.s32.totalorder %s979_s13, 1 }
  0x2d   : > { %s123_s18 = sand.u32 1, %s930_s11   ;;  %s709_s20 = sshll.u32 %s934_s12, 10 }
  0x2e   : > { %p1052_p12 = por %p1195_p10, %p33_p2  ;;  %s686_s24 = sshll.u32 %s123_s18, 6 }
  0x2f   : > { %s1061_s27 = scalar_lea.hbm %s1185_s0, %s709_s20  ;;  %s127_s19 = scalar_lea.vmem [#allocation2], %s686_s24 }
  0x30   : > { %s135_s22 = sshll.u32 %s127_s19, 4  ;;  %p1063_p11 = pnand %p765_p6, %p35_p8  ;;  %s1067_s22 = int_to_ptr.vmem [resolvable:$true] %s135_s22 }
  0x31   : > { %s1069_s28 = scalar_lea.sflag [#allocation3], %s123_s18  ;;  %s834_s29 = scalar_lea.hbm %s1061_s27, 1024 }
  0x32   : > { %p835_p13 = scmp.ne.s32.totalorder %s1061_s27, %s834_s29  ;;  %p836_p0 = pneg %p1063_p11 }
  0x33   : > { %s839_s6 = scalar_lea.hbm %s1185_s0, 2048  ;;  %p840_p7 = scmp.lt.u32.totalorder %s1061_s27, %s1185_s0 }
  0x34   : > { %p837_p3 = pnand %p836_p0, %p835_p13  ;;  %p841_p9 = scmp.lt.u32.totalorder %s839_s6, %s834_s29 }
  0x35   : > { %p843_p2 = scmp.lt.u32.totalorder %s834_s29, %s1061_s27 }
  0x36   : > { %p838_p5 = pneg %p837_p3  ;;  %p842_p1 = por %p841_p9, %p840_p7 }
  0x38   : > { %p844_p4 = por %p843_p2, %p842_p1 }
  0x3a   : > { %p845_p6 = pnand %p844_p4, %p838_p5 }
  0x3c   : > { %848 = shalt.err (!%p845_p6)
}
  0x3d   : > { %s849_s18 = scalar_lea.vmem %s1067_s22, 1024  ;;  %s939_s24 = smov [#allocation2]  }
  0x3e   : > { %p850_p8 = scmp.ne.s32.totalorder %s1067_s22, %s849_s18  ;;  %s854_s25 = sshll.u32 %s939_s24, 4  ;;  %s855_s25 = int_to_ptr.vmem [resolvable:$false] %s854_s25 }
  0x3f   : > { %s856_s26 = scalar_lea.vmem %s855_s25, 2048  ;;  %p857_p3 = scmp.lt.s32.totalorder %s1067_s22, %s855_s25 }
  0x40   : > { %p852_p10 = pnand %p850_p8, %p836_p0  ;;  %p858_p7 = scmp.lt.s32.totalorder %s856_s26, %s849_s18 }
  0x42   : > { %p853_p13 = pneg %p852_p10  ;;  %p859_p9 = por %p858_p7, %p857_p3 }
  0x44   : > { %p860_p1 = pnand %p859_p9, %p853_p13 }
  0x46   : > { %863 = shalt.err (!%p860_p1)
}
  0x47   : > { %759 = dma.hbm_to_vmem [thread:$0]  (!%p1063_p11), %s1061_s27, 1024, %s1067_s22, %s1069_s28, %s937_s4, %s937_s4, %s938_s5  }
  0x48   : > { %p1198_p0 = scmp.ne.s32.totalorder %s1193_s17, 0 }
  0x49   : > { %s1103_s19 = sand.u32 (!%p1198_p0), 1, %s926_s10   ;;  %p1199_p5 = scmp.ne.s32.totalorder (!%p1198_p0), %s1191_s15, 0 }
  0x4a   : > { %147 = sbr.rel (%p1198_p0) target bundleno = 596 (0x254), region = 28  ;;  %s691_s29 = sshll.u32 (!%p1198_p0), %s1103_s19, 6 }
  0x4b   : > { %s150_s30 = scalar_lea.sflag (!%p1198_p0), [#allocation3], %s1103_s19  ;;  %s153_s23 = scalar_lea.vmem (!%p1198_p0), [#allocation2], %s691_s29 }
  0x51   : > { %909 = dma.done.wait (%p1199_p5), %s150_s30, 1024  }
  0x52   : > { %911 = vsyncadd (%p1199_p5), %s150_s30, 4294966272  ;;  %p1200_p11 = scmp.eq.s32.totalorder %s979_s13, 0 }
  0x54   : > { %913 = dma.done.wait (%p1200_p11), [#allocation6], 256   ;;  %p1201_p2 = pmov %p1200_p11 }
  0x55   : > { %v180_v0 = vld [vmem:[%s153_s23] sm:$0xff]  ;;  %v181_v2 = vld [vmem:[%s153_s23 + $0x8] sm:$0xff]  ;;  %v182_v7 = vld [vmem:[%s153_s23 + $0x10] sm:$0xff]  ;;  %vm318_vm0 = vcmask 130048   ;;  %s177_s15 = scalar_lea.vmem [#allocation7], %s691_s29  ;;  %s711_s4 = sshll.u32 %s979_s13, 10 }
  0x56   : > { %915 = vsyncadd (%p1201_p2), [#allocation6], 4294967040  ;;  %v184_v1 = vld [vmem:[%s153_s23 + $0x20] sm:$0xff]  ;;  %188 = vxpose.xlu0.b32.start [1/2] (short) (narrow) %v180_v0, 16  ;;  %v185_v3 = vld [vmem:[%s153_s23 + $0x28] sm:$0xff]  ;;  %s599_s17 = sshll.u32 %s177_s15, 4  ;;  %s1140_s22 = scalar_lea.hbm %s1187_s2, %s711_s4  ;;  %s1134_s17 = int_to_ptr.vmem [resolvable:$true] %s599_s17 }
  0x57   : > { %252 = vxpose.xlu1.b32.start [1/2] (short) (narrow) %v184_v1, 16  ;;  %v316_v4 = vld [vmem:[#allocation5] sm:$0xff]  ;;  %v317_v5 = vld [vmem:[#allocation5 + $0x8] sm:$0xff]  ;;  %v186_v8 = vld [vmem:[%s153_s23 + $0x30] sm:$0xff]  ;;  %s585_s28 = scalar_lea.sflag [#allocation4], %s1103_s19  ;;  %s864_s3 = scalar_lea.vmem %s1134_s17, 1024 }
  0x58   : > { %v738_v6 = vpack.c.bf16 %v317_v5, %v316_v4  ;;  %v183_v9 = vld [vmem:[%s153_s23 + $0x18] sm:$0xff]  ;;  %p865_p4 = scmp.ne.s32.totalorder %s1134_s17, %s864_s3  ;;  %s940_s13 = smov [#allocation7]  }
  0x59   : > { %v187_v10 = vld [vmem:[%s153_s23 + $0x38] sm:$0xff]  ;;  %s868_s6 = sshll.u32 %s940_s13, 4  ;;  %s869_s6 = int_to_ptr.vmem [resolvable:$false] %s868_s6 }
  0x5a   : > { %189 = vxpose.xlu0.b32.end [2/2] (short) (narrow) %v181_v2, 16  ;;  %739 = vmatprep.subr.bf16.mxu0 %v738_v6  ;;  %p866_p6 = pnand %p865_p4, %p1052_p12  ;;  %s870_s7 = scalar_lea.vmem %s869_s6, 2048 }
  0x5b   : > { %253 = vxpose.xlu1.b32.end [2/2] (short) (narrow) %v185_v3, 16  ;;  %742 = vmatprep.subr.bf16.mxu1 %v738_v6  ;;  %p871_p10 = scmp.lt.s32.totalorder %s1134_s17, %s869_s6  ;;  %p872_p13 = scmp.lt.s32.totalorder %s870_s7, %s864_s3 }
  0x5c   : > { %741 = vmatpush3.bf16.msra.mxu0 %v738_v6  ;;  %743 = vmatpush3.bf16.msra.mxu1 %v738_v6  ;;  %p867_p8 = pneg %p866_p6 }
  0x5d   : > { %p873_p3 = por %p872_p13, %p871_p10 }
  0x5e   : > { %220 = vxpose.xlu0.b32.start [1/2] (short) (narrow) %v182_v7, 16 }
  0x5f   : > { %284 = vxpose.xlu1.b32.start [1/2] (short) (narrow) %v186_v8, 16  ;;  %p874_p7 = pnand %p873_p3, %p867_p8 }
  0x62   : > { %221 = vxpose.xlu0.b32.end [2/2] (short) (narrow) %v183_v9, 16 }
  0x63   : > { %285 = vxpose.xlu1.b32.end [2/2] (short) (narrow) %v187_v10, 16 }
  0xd6   : > { %v204_v11 = vpop.trf.xlu0 }
  0xd7   : > { %v268_v12 = vpop.trf.xlu1  ;;  %726 = vmatprep.mubr.msk.f32.mxu0 %vm318_vm0, %v204_v11 }
  0xd8   : > { %732 = vmatprep.mubr.msk.f32.mxu1 %vm318_vm0, %v268_v12 }
  0xda   : > { %v205_v13 = vpop.trf.xlu0 }
  0xdb   : > { %v269_v14 = vpop.trf.xlu1  ;;  %727 = vmatmul.mubr.msk.f32.vlgmr.msra.gmra.mrb[0].mxu0 %vm318_vm0, %v205_v13 }
  0xdc   : > { %733 = vmatmul.mubr.msk.f32.vlgmr.msra.gmra.mrb[0].mxu1 %vm318_vm0, %v269_v14 }
  0xde   : > { %v236_v15 = vpop.trf.xlu0 }
  0xdf   : > { %v300_v16 = vpop.trf.xlu1  ;;  %729 = vmatprep.mubr.msk.f32.mxu0 %vm318_vm0, %v236_v15 }
  0xe0   : > { %735 = vmatprep.mubr.msk.f32.mxu1 %vm318_vm0, %v300_v16 }
  0xe2   : > { %v237_v17 = vpop.trf.xlu0 }
  0xe3   : > { %v301_v18 = vpop.trf.xlu1  ;;  %730 = vmatmul.mubr.msk.f32.gmra.mrb[2].mxu0 %vm318_vm0, %v237_v17 }
  0xe4   : > { %736 = vmatmul.mubr.msk.f32.gmra.mrb[2].mxu1 %vm318_vm0, %v301_v18 }
 0x1ae   : > { %v728_v19 = vpop.f32.mrb[0].mxu0 }
 0x1af   : > { %v734_v20 = vpop.f32.mrb[0].mxu1  ;;  %v409_v21 = vpop.f32.mrb[1].mxu0 }
 0x1b0   : > { %v429_v22 = vpop.f32.mrb[1].mxu1  ;;  %448 = vxpose.xlu0.b32.start [1/2] (short) (narrow) %v409_v21, 16 }
 0x1b4   : > { %449 = vxpose.xlu0.b32.end [2/2] (short) (narrow) %v728_v19, 16 }
 0x1b6   : > { %v731_v23 = vpop.f32.mrb[2].mxu0 }
 0x1b7   : > { %v737_v24 = vpop.f32.mrb[2].mxu1  ;;  %v419_v25 = vpop.f32.mrb[3].mxu0 }
 0x1b8   : > { %v439_v26 = vpop.f32.mrb[3].mxu1  ;;  %512 = vxpose.xlu0.b32.start [1/2] (short) (narrow) %v429_v22, 16  ;;  %480 = vxpose.xlu1.b32.start [1/2] (short) (narrow) %v419_v25, 16 }
 0x1bc   : > { %513 = vxpose.xlu0.b32.end [2/2] (short) (narrow) %v734_v20, 16  ;;  %481 = vxpose.xlu1.b32.end [2/2] (short) (narrow) %v731_v23, 16 }
 0x1c0   : > { %544 = vxpose.xlu1.b32.start [1/2] (short) (narrow) %v439_v26, 16 }
 0x1c4   : > { %545 = vxpose.xlu1.b32.end [2/2] (short) (narrow) %v737_v24, 16 }
 0x230   : > { %v464_v27 = vpop.trf.xlu0 }
 0x231   : > { %576 = vst.msk [vmem:[%s177_s15] sm:$0xff] %vm318_vm0, %v464_v27 }
 0x234   : > { %v465_v28 = vpop.trf.xlu0 }
 0x235   : > { %577 = vst.msk [vmem:[%s177_s15 + $0x8] sm:$0xff] %vm318_vm0, %v465_v28 }
 0x238   : > { %v496_v29 = vpop.trf.xlu1  ;;  %v528_v30 = vpop.trf.xlu0 }
 0x239   : > { %578 = vst.msk [vmem:[%s177_s15 + $0x10] sm:$0xff] %vm318_vm0, %v496_v29  ;;  %580 = vst.msk [vmem:[%s177_s15 + $0x20] sm:$0xff] %vm318_vm0, %v528_v30 }
 0x23c   : > { %v497_v31 = vpop.trf.xlu1  ;;  %v529_v32 = vpop.trf.xlu0 }
 0x23d   : > { %579 = vst.msk [vmem:[%s177_s15 + $0x18] sm:$0xff] %vm318_vm0, %v497_v31  ;;  %581 = vst.msk [vmem:[%s177_s15 + $0x28] sm:$0xff] %vm318_vm0, %v529_v32 }
 0x240   : > { %v560_v33 = vpop.trf.xlu1 }
 0x241   : > { %582 = vst.msk [vmem:[%s177_s15 + $0x30] sm:$0xff] %vm318_vm0, %v560_v33 }
 0x244   : > { %v561_v34 = vpop.trf.xlu1 }
 0x245   : > { %583 = vst.msk [vmem:[%s177_s15 + $0x38] sm:$0xff] %vm318_vm0, %v561_v34 }
 0x246   : > { %877 = shalt.err (!%p874_p7)
}
 0x247   : > { %s878_s20 = scalar_lea.hbm %s1140_s22, 1024  ;;  %s882_s25 = scalar_lea.hbm %s1187_s2, 2048 }
 0x248   : > { %p879_p9 = scmp.ne.s32.totalorder %s1140_s22, %s878_s20  ;;  %p883_p5 = scmp.lt.u32.totalorder %s1140_s22, %s1187_s2 }
 0x249   : > { %p884_p11 = scmp.lt.u32.totalorder %s882_s25, %s878_s20  ;;  %p886_p4 = scmp.lt.u32.totalorder %s878_s20, %s1140_s22 }
 0x24a   : > { %p880_p1 = pnand %p879_p9, %p1052_p12 }
 0x24b   : > { %p885_p2 = por %p884_p11, %p883_p5 }
 0x24c   : > { %p881_p0 = pneg %p880_p1 }
 0x24d   : > { %p887_p6 = por %p886_p4, %p885_p2 }
 0x24f   : > { %p888_p8 = pnand %p887_p6, %p881_p0 }
 0x251   : > { %891 = shalt.err (!%p888_p8)
}
 0x252   : > { %s941_s30 = smov 128   ;;  %s942_s23 = smov 8  }
 0x253   : > { %750 = dma.vmem_to_hbm [thread:$0]  (%p1052_p12), %s1134_s17, 1024, %s1140_s22, %s585_s28, %s941_s30, %s941_s30, %s942_s23  }
 0x254 PF: > { %s614_s15 = sand.u32 1, %s922_s9   ;;  %p1202_p10 = scmp.ne.s32.totalorder %s1192_s16, 0 }
 0x255   : > { %p1203_p13 = scmp.ge.s32.totalorder %s934_s12, 2  ;;  %s615_s4 = scalar_lea.sflag [#allocation4], %s614_s15 }
 0x257   : > { %p761_p3 = pnand %p1203_p13, %p1202_p10 }
 0x259   : > { %917 = dma.done.wait (!%p761_p3), %s615_s4, 1024  }
 0x25a   : > { %919 = vsyncadd (!%p761_p3), %s615_s4, 4294966272  ;;  %p16_p7 = scmp.ge.s32.totalorder %s1014_s21, 4   ;;  %s1204_s9 = smov %s926_s10 }
 0x25b   : > { %s1205_s10 = smov %s930_s11  ;;  %s1206_s11 = smov %s1048_s8 }
 0x25c   : > { %s1207_s12 = smov %s1014_s21  ;;  %18 = sbr.rel (!%p16_p7) target bundleno = 6 (0x6), region = 77 }
 0x263   :  { %620 = vsyncpa [#allocation3], 1 }
 0x264   :  { %622 = vsyncpa [#allocation3 + $0x1], 1 }
 0x265   :  { %623 = vsyncpa [#allocation6], 1 }
 0x266   :  { %624 = vsyncpa [#allocation4], 1 }
 0x267   :  { %626 = vsyncpa [#allocation4 + $0x1], 1 }

</bundles_post_ra>
